<compile_context>
chip_gen: v5e
topology: v5e:2x2
jax: 0.10.0
libtpu: 0.0.40
codegen_flags: <defaults>
</compile_context>

<pallas_src>
import jax
import jax.numpy as jnp
from jax.experimental import pallas as pl
from jax.experimental.pallas import tpu as pltpu

_LANES = 128
_SUBLANES = 8
_TILE_ROWS = 1024  # (1024,128) f32 = 512 KiB/buffer; 8 double-buffered bufs = 4 MiB


def _double_prelu_kernel(x_ref, a_ref, b_ref, o_ref):
    # Chained PReLU.  Do NOT fold a*b into one select: if a < 0 a negative
    # input becomes positive and the second select flips.
    x = x_ref[...]
    t = jnp.where(x >= 0, x, a_ref[...] * x)
    o_ref[...] = jnp.where(t >= 0, t, b_ref[...] * t)


def _broadcast_slope(w, x):
    """Broadcast a PReLU weight to x.shape with PyTorch semantics."""
    w = jnp.reshape(w.astype(x.dtype), (-1,))
    if w.size == 1:
        return jnp.broadcast_to(w.reshape((1,) * x.ndim), x.shape)
    assert x.ndim >= 2, "per-channel PReLU weight needs input ndim >= 2"
    C = x.shape[1]
    assert w.size == C, "PReLU weight size must match channel dim"
    shape = [1] * x.ndim
    shape[1] = C
    return jnp.broadcast_to(w.reshape(shape), x.shape)


def _run_slab(x_slab, a_slab, b_slab):
    """Run the elementwise kernel on lane-dense (rows, 128) slabs."""
    rows, lanes = x_slab.shape
    if rows <= _TILE_ROWS:
        # Small case: no grid, whole arrays resident in VMEM, no pipelining.
        return pl.pallas_call(
            _double_prelu_kernel,
            out_shape=jax.ShapeDtypeStruct(x_slab.shape, x_slab.dtype),
            in_specs=[pl.BlockSpec(memory_space=pltpu.MemorySpace.VMEM)] * 3,
            out_specs=pl.BlockSpec(memory_space=pltpu.MemorySpace.VMEM),
        )(x_slab, a_slab, b_slab)

    # Large-tensor path: lane-dense row tiles + "parallel" grid (megacore).
    pad_rows = (-rows) % _TILE_ROWS
    if pad_rows:
        pad = ((0, pad_rows), (0, 0))
        x_slab = jnp.pad(x_slab, pad)
        a_slab = jnp.pad(a_slab, pad)
        b_slab = jnp.pad(b_slab, pad)
    padded_rows = rows + pad_rows
    spec = pl.BlockSpec((_TILE_ROWS, lanes), lambda i: (i, 0))
    out = pl.pallas_call(
        _double_prelu_kernel,
        out_shape=jax.ShapeDtypeStruct((padded_rows, lanes), x_slab.dtype),
        grid=(padded_rows // _TILE_ROWS,),
        in_specs=[spec] * 3,
        out_specs=spec,
        compiler_params=pltpu.CompilerParams(
            dimension_semantics=("parallel",)),
    )(x_slab, a_slab, b_slab)
    return out[:rows]


def fused_double_prelu_batch(tensors):
    """tensors: sequence of (x, w_first, w_second).

    Computes F.prelu(F.prelu(x, w_first), w_second) for every tensor with
    PyTorch semantics, fused into a single pallas_call over packed slabs.
    """
    dtype = tensors[0][0].dtype
    xs, aas, bbs, metas = [], [], [], []
    offset = 0
    for x, wa, wb in tensors:
        assert x.dtype == dtype, "all tensors must share a dtype to be packed"
        xs.append(jnp.reshape(x, (-1,)))
        aas.append(jnp.reshape(_broadcast_slope(wa, x), (-1,)))
        bbs.append(jnp.reshape(_broadcast_slope(wb, x), (-1,)))
        metas.append((offset, x.size, x.shape))
        offset += x.size

    total = offset
    align = _SUBLANES * _LANES
    padded_total = ((total + align - 1) // align) * align
    pad = padded_total - total
    rows = padded_total // _LANES

    def pack(parts):
        flat = jnp.concatenate(parts) if len(parts) > 1 else parts[0]
        if pad:
            flat = jnp.pad(flat, (0, pad))  # padded x == 0 -> slope irrelevant
        return flat.reshape(rows, _LANES)

    out_slab = _run_slab(pack(xs), pack(aas), pack(bbs))
    out_flat = out_slab.reshape(-1)
    return tuple(out_flat[off:off + size].reshape(shape)
                 for off, size, shape in metas)


def model_forward(x, y, z, w, w0, w1, w2, w3, params):
    """Equivalent of Model.forward from tools/pnnx/tests/test_F_prelu.py."""
    return fused_double_prelu_batch([
        (x, w0, params["w4"]),
        (y, w1, params["w5"]),
        (z, w2, params["w6"]),
        (w, w3, params["w7"]),
    ])


def _prelu_ref(x, w):
    """Pure-JAX reference mirroring torch.nn.functional.prelu."""
    C = x.shape[1]
    w = jnp.reshape(w, (-1,))
    w = jnp.broadcast_to(w, (C,)) if w.size == 1 else w
    shape = [1] * x.ndim
    shape[1] = C
    return jnp.where(x >= 0, x, w.reshape(shape) * x)


if __name__ == "__main__":
    key = jax.random.PRNGKey(0)
    keys = jax.random.split(key, 12)

    # Module parameters (torch.rand equivalents), deterministic.
    params = {
        "w4": jax.random.uniform(keys[0], (16,), jnp.float32),
        "w5": jax.random.uniform(keys[1], (2,), jnp.float32),
        "w6": jax.random.uniform(keys[2], (3,), jnp.float32),
        "w7": jax.random.uniform(keys[3], (1,), jnp.float32),
    }

    # Inputs (small shapes consistent with the PReLU weight sizes).
    x = jax.random.normal(keys[4], (2, 16), jnp.float32)          # channels = 16
    y = jax.random.normal(keys[5], (2, 2, 16), jnp.float32)       # channels = 2
    z = jax.random.normal(keys[6], (2, 3, 12, 16), jnp.float32)   # channels = 3
    w = jax.random.normal(keys[7], (2, 4, 8, 8), jnp.float32)     # 1-elem slope

    w0 = jax.random.uniform(keys[8], (16,), jnp.float32)
    w1 = jax.random.uniform(keys[9], (2,), jnp.float32)
    w2 = jax.random.uniform(keys[10], (3,), jnp.float32)
    w3 = jax.random.uniform(keys[11], (1,), jnp.float32)

    outs = model_forward(x, y, z, w, w0, w1, w2, w3, params)
    outs = jax.block_until_ready(outs)

    # Correctness check against pure-JAX chained PReLU reference.
    refs = (
        _prelu_ref(_prelu_ref(x, w0), params["w4"]),
        _prelu_ref(_prelu_ref(y, w1), params["w5"]),
        _prelu_ref(_prelu_ref(z, w2), params["w6"]),
        _prelu_ref(_prelu_ref(w, w3), params["w7"]),
    )
    for o, r in zip(outs, refs):
        assert o.shape == r.shape and o.dtype == r.dtype
        assert jnp.max(jnp.abs(o - r)) < 1e-5

    print("KERNEL_OK")
</pallas_src>

<mosaic_0001>
module attributes {stable_mosaic.version = 11 : i64} {
  func.func @_double_prelu_kernel(%arg0: memref<16x128xf32, #tpu.memory_space<vmem>>, %arg1: memref<16x128xf32, #tpu.memory_space<vmem>>, %arg2: memref<16x128xf32, #tpu.memory_space<vmem>>, %arg3: memref<16x128xf32, #tpu.memory_space<vmem>>) attributes {dimension_semantics = [], scalar_prefetch = 0 : i64, scratch_operands = 0 : i64, tpu.core_type = #tpu.core_type<tc>} {
    %c0 = arith.constant 0 : index
    %c0_0 = arith.constant 0 : index
    %0 = vector.load %arg0[%c0, %c0_0] : memref<16x128xf32, #tpu.memory_space<vmem>>, vector<16x128xf32>
    %cst = arith.constant 0.000000e+00 : f32
    %1 = vector.broadcast %cst : f32 to vector<16x128xf32>
    %2 = arith.cmpf oge, %0, %1 : vector<16x128xf32>
    %c0_1 = arith.constant 0 : index
    %c0_2 = arith.constant 0 : index
    %3 = vector.load %arg1[%c0_1, %c0_2] : memref<16x128xf32, #tpu.memory_space<vmem>>, vector<16x128xf32>
    %4 = arith.mulf %3, %0 : vector<16x128xf32>
    %5 = arith.select %2, %0, %4 : vector<16x128xi1>, vector<16x128xf32>
    %cst_3 = arith.constant 0.000000e+00 : f32
    %6 = vector.broadcast %cst_3 : f32 to vector<16x128xf32>
    %7 = arith.cmpf oge, %5, %6 : vector<16x128xf32>
    %c0_4 = arith.constant 0 : index
    %c0_5 = arith.constant 0 : index
    %8 = vector.load %arg2[%c0_4, %c0_5] : memref<16x128xf32, #tpu.memory_space<vmem>>, vector<16x128xf32>
    %9 = arith.mulf %8, %5 : vector<16x128xf32>
    %10 = arith.select %7, %5, %9 : vector<16x128xi1>, vector<16x128xf32>
    %c0_6 = arith.constant 0 : index
    %c0_7 = arith.constant 0 : index
    %11 = vector.load %arg3[%c0_6, %c0_7] : memref<16x128xf32, #tpu.memory_space<vmem>>, vector<16x128xf32>
    tpu.vector_store %arg3[%c0_6, %c0_7], %10 {strides = array<i32>} : memref<16x128xf32, #tpu.memory_space<vmem>>, vector<16x128xf32>,
    return
  }
}

</mosaic_0001>

<bundles_post_ra>
// kernel: tpu_custom_call.1
= control target key start
LH: loop header
LB: loop body
LE: loop exit
PB: predicated region body
PF: predicated region fallthrough
CT: control target
= control target key end

     0   :  { %8 = vsyncpa [#allocation3], 0  ;;  %s260_s0 = inlined_call_operand.hbm [shape: f32[16,128], index: 0, kind: input, shape index: {}]   ;;  %s261_s1 = inlined_call_operand.hbm [shape: f32[16,128], index: 1, kind: input, shape index: {}]   ;;  %s262_s2 = inlined_call_operand.hbm [shape: f32[16,128], index: 2, kind: input, shape index: {}]   ;;  %s263_s3 = inlined_call_operand.hbm [shape: f32[16,128], index: 3, kind: output, shape index: {}]  }
   0x1   :  { %9 = vsyncpa [#allocation6], 0 }
   0x2   :  { %10 = vsyncpa [#allocation4], 0  ;;  %s28_s14 = sshll.u32 %s261_s1, 4  ;;  %s210_s15 = smov [#allocation5]   ;;  %s29_s14 = int_to_ptr.hbm [resolvable:$true] %s28_s14 }
   0x3   :  { %s30_s16 = sshll.u32 %s210_s15, 4  ;;  %s15_s19 = sshll.u32 %s260_s0, 4  ;;  %s31_s16 = int_to_ptr.vmem [resolvable:$true] %s30_s16  ;;  %s16_s19 = int_to_ptr.hbm [resolvable:$true] %s15_s19 }
   0x4   :  { %s211_s20 = smov 128   ;;  %s212_s21 = smov 8  }
   0x5   :  { %36 = dma.hbm_to_vmem [thread:$0]  %s29_s14, 256, %s31_s16, [#allocation6], %s211_s20, %s211_s20, %s212_s21  }
   0x6   :  { %s213_s22 = smov [#allocation2]   ;;  %s41_s1 = sshll.u32 %s262_s2, 4  ;;  %s42_s1 = int_to_ptr.hbm [resolvable:$true] %s41_s1 }
   0x7   :  { %s17_s23 = sshll.u32 %s213_s22, 4  ;;  %s214_s0 = smov [#allocation7]   ;;  %s18_s23 = int_to_ptr.vmem [resolvable:$true] %s17_s23 }
   0x8   :  { %23 = dma.hbm_to_vmem [thread:$0]  %s16_s19, 256, %s18_s23, [#allocation3], %s211_s20, %s211_s20, %s212_s21  }
   0x9   :  { %s43_s26 = sshll.u32 %s214_s0, 4  ;;  %s44_s26 = int_to_ptr.vmem [resolvable:$true] %s43_s26 }
   0xa   :  { %49 = dma.hbm_to_vmem [thread:$0]  %s42_s1, 256, %s44_s26, [#allocation6], %s211_s20, %s211_s20, %s212_s21  }
   0xb   :  { %204 = dma.done.wait [#allocation3], 256  }
   0xc   :  { %205 = vsyncadd [#allocation3], 4294967040 }
   0xd   :  { %206 = dma.done.wait [#allocation6], 512  }
   0xe   :  { %207 = vsyncadd [#allocation6], 4294966784  ;;  %v62_v0 = vld [vmem:[#allocation2] sm:$0xff]  ;;  %v66_v1 = vld [vmem:[#allocation5] sm:$0xff]  ;;  %s215_s2 = smov [#allocation8]   ;;  %s88_s30 = sshll.u32 %s263_s3, 4  ;;  %s89_s30 = int_to_ptr.hbm [resolvable:$true] %s88_s30 }
   0xf   :  { %vm64_vm0 = vcmp.ge.f32.partialorder %v62_v0, 0.0  ;;  %v68_v2 = vmul.f32 %v66_v1, %v62_v0  ;;  %v74_v3 = vld [vmem:[#allocation7] sm:$0xff]  ;;  %v63_v4 = vld [vmem:[#allocation2 + $0x8] sm:$0xff]  ;;  %v67_v5 = vld [vmem:[#allocation5 + $0x8] sm:$0xff]  ;;  %s86_s27 = sshll.u32 %s215_s2, 4  ;;  %s87_s27 = int_to_ptr.vmem [resolvable:$true] %s86_s27 }
  0x10   :  { %vm65_vm1 = vcmp.ge.f32.partialorder %v63_v4, 0.0  ;;  %v69_v6 = vmul.f32 %v67_v5, %v63_v4  ;;  %v75_v7 = vld [vmem:[#allocation7 + $0x8] sm:$0xff] }
  0x11   :  { %v70_v8 = vsel %vm64_vm0, %v62_v0, %v68_v2 }
  0x12   :  { %vm72_vm2 = vcmp.ge.f32.partialorder %v70_v8, 0.0  ;;  %v76_v9 = vmul.f32 %v74_v3, %v70_v8  ;;  %v71_v10 = vsel %vm65_vm1, %v63_v4, %v69_v6 }
  0x13   :  { %vm73_vm3 = vcmp.ge.f32.partialorder %v71_v10, 0.0  ;;  %v77_v11 = vmul.f32 %v75_v7, %v71_v10 }
  0x14   :  { %v78_v12 = vsel %vm72_vm2, %v70_v8, %v76_v9 }
  0x15   :  { %80 = vst [vmem:[#allocation8] sm:$0xff] %v78_v12  ;;  %v79_v13 = vsel %vm73_vm3, %v71_v10, %v77_v11 }
  0x16   :  { %81 = vst [vmem:[#allocation8 + $0x8] sm:$0xff] %v79_v13 }
  0x17   :  { %94 = dma.vmem_to_hbm [thread:$0]  %s87_s27, 256, %s89_s30, [#allocation4], %s211_s20, %s211_s20, %s212_s21  }
  0x18   :  { %208 = dma.done.wait [#allocation4], 256  }
  0x19   :  { %209 = vsyncadd [#allocation4], 4294967040 }
  0x1a   :  { %99 = vsyncpa [#allocation3], 1 }
  0x1b   :  { %100 = vsyncpa [#allocation6], 1 }
  0x1c   :  { %101 = vsyncpa [#allocation4], 1 }

</bundles_post_ra>
